<compile_context>
chip_gen: v5e
topology: v5e:2x2
jax: 0.10.0
libtpu: 0.0.40
codegen_flags: <defaults>
</compile_context>

<pallas_src>
import jax
import jax.numpy as jnp
from jax.experimental import pallas as pl
from jax.experimental.pallas import tpu as pltpu


def _round_up(a, b):
    return (a + b - 1) // b * b


def _vmem_budget_bytes():
    """Usable VMEM budget, generation-aware.

    v5e/v6e have 128 MiB of VMEM per TensorCore, v7x only 64 MiB; take 3/4 of
    whatever the runtime reports, falling back to a conservative 64-MiB chip
    assumption if the query is unavailable."""
    phys = 64 * 1024 * 1024
    try:
        phys = int(pltpu.get_tpu_info().vmem_capacity_bytes)
    except Exception:
        pass
    return max(phys * 3 // 4, 16 * 1024 * 1024)


# ---------------------------------------------------------------------------
# Kernels
# ---------------------------------------------------------------------------
def _make_fc_resident_kernel(L, acts, m_true, m_pad, eps):
    """Single-shot kernel: x and all intermediates stay resident in VMEM and
    every layer's matmul runs exactly once (stats -> normalize in place)."""
    inv_count = 1.0 / float(m_true)

    def kernel(x_ref, *refs):
        w_refs = refs[0:L]            # padded conv weights (cin_p, cout_p)
        g_refs = refs[L:2 * L]        # BN gamma (1, cout_p)
        bt_refs = refs[2 * L:3 * L]   # BN beta  (1, cout_p)
        o_ref = refs[3 * L]           # padded output (m_pad, cp_last)

        # Row-validity mask (1, m_pad): rides the MXU reductions so padded
        # rows never contaminate the batch statistics.
        if m_pad != m_true:
            cols = jax.lax.broadcasted_iota(jnp.int32, (1, m_pad), 1)
            mask = (cols < m_true).astype(jnp.float32)
        else:
            mask = jnp.ones((1, m_pad), jnp.float32)

        h = x_ref[...]
        for l in range(L):
            # Conv bias omitted: a per-channel constant is cancelled exactly
            # by training-mode BatchNorm (mean subtraction).
            y = jnp.dot(h, w_refs[l][...], preferred_element_type=jnp.float32)
            # Per-channel batch stats via MXU matvecs (not an XLU/VPU
            # sublane reduce).  Two-pass (stable) variance.
            mean = jnp.dot(mask, y,
                           preferred_element_type=jnp.float32) * inv_count
            centered = y - mean
            var = jnp.dot(mask, centered * centered,
                          preferred_element_type=jnp.float32) * inv_count
            scale = g_refs[l][...] * jax.lax.rsqrt(var + eps)
            shift = bt_refs[l][...] - mean * scale
            h = y * scale + shift
            if acts[l]:
                h = jnp.maximum(h, 0.0)
        # Lane-dense (channel-padded) store; the wrapper slices to true width.
        o_ref[...] = h

    return kernel


def _make_fc_tiled_kernel(L, tm, acts, m_true, m_pad, eps):
    """(L+1)-phase fused kernel for an L-layer stack when the activation slab
    does not fit VMEM.  Intermediates never round-trip HBM."""
    inv_count = 1.0 / float(m_true)

    def kernel(x_ref, *refs):
        w_refs = refs[0:L]
        g_refs = refs[L:2 * L]
        bt_refs = refs[2 * L:3 * L]
        o_ref = refs[3 * L]
        scr = refs[3 * L + 1:]
        sum_refs = scr[0:L]             # per-layer channel sums
        sq_refs = scr[L:2 * L]          # per-layer channel sums of squares
        scale_refs = scr[2 * L:3 * L]   # gamma * rsqrt(var + eps)
        shift_refs = scr[3 * L:4 * L]   # beta  - mean * scale

        p = pl.program_id(0)            # phase: 0..L
        i = pl.program_id(1)            # M tile

        @pl.when(jnp.logical_and(p == 0, i == 0))
        def _():
            for l in range(L):
                sum_refs[l][...] = jnp.zeros_like(sum_refs[l])
                sq_refs[l][...] = jnp.zeros_like(sq_refs[l])

        # At the first tile of phase pp, finalize layer (pp-1)'s statistics.
        for pp in range(1, L + 1):
            @pl.when(jnp.logical_and(p == pp, i == 0))
            def _(pp=pp):
                l = pp - 1
                mean = sum_refs[l][...] * inv_count
                # E[y^2]-E[y]^2 (clamped).  TODO(synk): shifted / two-pass
                # variance for ill-conditioned inputs.
                var = jnp.maximum(sq_refs[l][...] * inv_count - mean * mean,
                                  0.0)
                scale = g_refs[l][...] * jax.lax.rsqrt(var + eps)
                scale_refs[l][...] = scale
                shift_refs[l][...] = bt_refs[l][...] - mean * scale

        # Row-validity mask for this tile, consumed by the MXU reductions.
        if m_pad != m_true:
            cols = jax.lax.broadcasted_iota(jnp.int32, (1, tm), 1) + i * tm
            mask = (cols < m_true).astype(jnp.float32)
        else:
            mask = jnp.ones((1, tm), jnp.float32)

        x = x_ref[...]
        for pp in range(L + 1):
            @pl.when(p == pp)
            def _(pp=pp):
                h = x
                # Layers whose BN stats are already finalized.
                for l in range(min(pp, L)):
                    y = jnp.dot(h, w_refs[l][...],
                                preferred_element_type=jnp.float32)
                    h = y * scale_refs[l][...] + shift_refs[l][...]
                    if acts[l]:
                        h = jnp.maximum(h, 0.0)
                if pp < L:
                    # Stats pass for layer pp (conv bias omitted, see above).
                    y = jnp.dot(h, w_refs[pp][...],
                                preferred_element_type=jnp.float32)
                    sum_refs[pp][...] += jnp.dot(
                        mask, y, preferred_element_type=jnp.float32)
                    sq_refs[pp][...] += jnp.dot(
                        mask, y * y, preferred_element_type=jnp.float32)
                else:
                    # Final phase: lane-dense padded store of the last layer.
                    o_ref[...] = h

    return kernel


# ---------------------------------------------------------------------------
# Parameter helpers
# ---------------------------------------------------------------------------
def init_fc_params(key, input_dims, units):
    """Init matching the PyTorch module: xavier_uniform 1x1-conv weights,
    zero conv bias, fresh BatchNorm2d (gamma=1, beta=0)."""
    params = []
    for cin, cout in zip(input_dims, units):
        key, kw = jax.random.split(key)
        limit = (6.0 / (cin + cout)) ** 0.5
        w = jax.random.uniform(kw, (cin, cout), jnp.float32, -limit, limit)
        b = jnp.zeros((cout,), jnp.float32)
        gamma = jnp.ones((cout,), jnp.float32)
        beta = jnp.zeros((cout,), jnp.float32)
        params.append((w, b, gamma, beta))
    return params


def _pad_params(params, C):
    """Zero-pad every layer's channel dims to multiples of 128 (lane-dense)."""
    couts, cps, cinps = [], [], []
    w_pads, g_pads, bt_pads = [], [], []
    cin_real, cin_pad = C, C               # layer 0 keeps its real input width
    for (w, _bias, gamma, beta) in params:
        assert w.shape[0] == cin_real, "layer input dim mismatch"
        cout = w.shape[1]
        cp = _round_up(cout, 128)
        wp = jnp.zeros((cin_pad, cp), jnp.float32)
        wp = wp.at[:cin_real, :cout].set(w.astype(jnp.float32))
        gp = jnp.zeros((1, cp), jnp.float32).at[0, :cout].set(
            gamma.astype(jnp.float32))
        bp = jnp.zeros((1, cp), jnp.float32).at[0, :cout].set(
            beta.astype(jnp.float32))
        w_pads.append(wp)
        g_pads.append(gp)
        bt_pads.append(bp)
        couts.append(cout)
        cps.append(cp)
        cinps.append(cin_pad)
        cin_real, cin_pad = cout, cp
    return w_pads, g_pads, bt_pads, couts, cps, cinps


# ---------------------------------------------------------------------------
# Forward
# ---------------------------------------------------------------------------
def fc_forward(x, params, activations, *, eps=1e-5, force_tiled=False,
               tm_target=None, vmem_limit_bytes=None):
    """FC.forward (training-mode BN).  x: [B, T, N, C] -> [B, T, N, units[-1]]."""
    B, T, N, C = x.shape
    M = B * T * N
    L = len(params)
    assert len(activations) == L
    acts = tuple(bool(a) for a in activations)

    h = x.reshape(M, C).astype(jnp.float32)
    w_pads, g_pads, bt_pads, couts, cps, cinps = _pad_params(params, C)
    cout_last, cp_last, cp_max = couts[-1], cps[-1], max(cps)

    budget = int(vmem_limit_bytes or _vmem_budget_bytes())

    # Per-row VMEM cost (bytes): x block is lane-padded to >=128 lanes and
    # double-buffered, padded output block is double-buffered, plus live f32
    # intermediates (h, y, centered, square, result) of the widest layer.
    cin_lane = max(_round_up(C, 128), 128)
    per_row = 4 * (2 * cin_lane + 2 * cp_last + 5 * cp_max)
    const_bytes = (sum(int(w.size) for w in w_pads)
                   + sum(int(g.size) for g in g_pads)
                   + sum(int(b.size) for b in bt_pads)) * 4
    fixed = 4 * 1024 * 1024 + 2 * const_bytes   # margin + 2x-buffered consts

    m_pad8 = _round_up(M, 8)
    resident = (not force_tiled) and (m_pad8 * per_row + fixed <= budget)

    if resident:
        # -------- VMEM-resident fast path: one grid step, each layer once.
        m_pad = m_pad8
        if m_pad > M:
            h = jnp.pad(h, ((0, m_pad - M), (0, 0)))
        kernel = _make_fc_resident_kernel(L, acts, M, m_pad, eps)

        in_specs = [pl.BlockSpec((m_pad, C), lambda i: (0, 0))]
        in_specs += [pl.BlockSpec(w_pads[l].shape, lambda i: (0, 0))
                     for l in range(L)]
        in_specs += [pl.BlockSpec((1, cps[l]), lambda i: (0, 0))
                     for l in range(L)]
        in_specs += [pl.BlockSpec((1, cps[l]), lambda i: (0, 0))
                     for l in range(L)]
        out_spec = pl.BlockSpec((m_pad, cp_last), lambda i: (0, 0))

        flops = sum(2 * m_pad * ci * co for ci, co in zip(cinps, cps))
        flops += sum(4 * m_pad * co for co in cps)       # stats matvecs
        bytes_accessed = m_pad * C * 4 + m_pad * cp_last * 4 + const_bytes

        out = pl.pallas_call(
            kernel,
            out_shape=jax.ShapeDtypeStruct((m_pad, cp_last), jnp.float32),
            grid_spec=pltpu.PrefetchScalarGridSpec(
                num_scalar_prefetch=0,
                grid=(1,),
                in_specs=in_specs,
                out_specs=out_spec),
            compiler_params=pltpu.CompilerParams(
                dimension_semantics=("arbitrary",),
                vmem_limit_bytes=budget),
            cost_estimate=pl.CostEstimate(
                flops=int(flops),
                transcendentals=int(L * cp_max),
                bytes_accessed=int(bytes_accessed)),
        )(h, *w_pads, *g_pads, *bt_pads)
    else:
        # -------- Tiled (L+1)-phase fallback for large M.
        if tm_target is None:
            cap = 8192 if budget >= 64 * 1024 * 1024 else 4096
            tm_fit = max(8, (budget - fixed) // per_row // 8 * 8)
            tm_eff = max(8, min(cap, tm_fit))
        else:
            tm_eff = max(8, int(tm_target))
        n_tiles = pl.cdiv(M, tm_eff)
        tm = _round_up(pl.cdiv(M, n_tiles), 8)
        m_pad = tm * n_tiles
        if m_pad > M:
            h = jnp.pad(h, ((0, m_pad - M), (0, 0)))

        kernel = _make_fc_tiled_kernel(L, tm, acts, M, m_pad, eps)

        in_specs = [pl.BlockSpec((tm, C), lambda p, i: (i, 0))]
        in_specs += [pl.BlockSpec(w_pads[l].shape, lambda p, i: (0, 0))
                     for l in range(L)]
        in_specs += [pl.BlockSpec((1, cps[l]), lambda p, i: (0, 0))
                     for l in range(L)]
        in_specs += [pl.BlockSpec((1, cps[l]), lambda p, i: (0, 0))
                     for l in range(L)]
        # Output only materializes in the final phase; earlier phases pin the
        # block index at 0, so any early flush of block 0 (uninitialized) is
        # overwritten by the final phase before it matters.  Documented hack.
        out_spec = pl.BlockSpec((tm, cp_last), lambda p, i: (i * (p // L), 0))

        scratch_shapes = (
            [pltpu.VMEM((1, cps[l]), jnp.float32) for l in range(L)]     # sum
            + [pltpu.VMEM((1, cps[l]), jnp.float32) for l in range(L)]   # sumsq
            + [pltpu.VMEM((1, cps[l]), jnp.float32) for l in range(L)]   # scale
            + [pltpu.VMEM((1, cps[l]), jnp.float32) for l in range(L)])  # shift

        flops = 0
        for p in range(L + 1):
            for l in range(min(p, L)):
                flops += 2 * m_pad * cinps[l] * cps[l]
            if p < L:
                flops += 2 * m_pad * cinps[p] * cps[p] + 4 * m_pad * cps[p]
        bytes_accessed = ((L + 1) * m_pad * C * 4 + m_pad * cp_last * 4
                          + const_bytes)

        out = pl.pallas_call(
            kernel,
            out_shape=jax.ShapeDtypeStruct((m_pad, cp_last), jnp.float32),
            grid_spec=pltpu.PrefetchScalarGridSpec(
                num_scalar_prefetch=0,
                grid=(L + 1, n_tiles),
                in_specs=in_specs,
                out_specs=out_spec,
                scratch_shapes=scratch_shapes),
            compiler_params=pltpu.CompilerParams(
                # Both axes MUST stay sequential on one core: the stats
                # scratch is shared across all M tiles.
                dimension_semantics=("arbitrary", "arbitrary"),
                vmem_limit_bytes=budget),
            cost_estimate=pl.CostEstimate(
                flops=int(flops),
                transcendentals=int(L * cp_max),
                bytes_accessed=int(bytes_accessed)),
        )(h, *w_pads, *g_pads, *bt_pads)

    return out[:M, :cout_last].reshape(B, T, N, cout_last)


# ---------------------------------------------------------------------------
# Pure-JAX reference (conv bias + training-mode batch norm)
# ---------------------------------------------------------------------------
def fc_reference(x, params, activations, eps=1e-5):
    B, T, N, C = x.shape
    h = x.reshape(-1, C).astype(jnp.float32)
    for (w, b, gamma, beta), act in zip(params, activations):
        y = jnp.dot(h, w, precision=jax.lax.Precision.HIGHEST) + b
        mean = jnp.mean(y, axis=0, keepdims=True)
        var = jnp.mean((y - mean) ** 2, axis=0, keepdims=True)
        y = (y - mean) * jax.lax.rsqrt(var + eps) * gamma + beta
        if act:
            y = jnp.maximum(y, 0.0)
        h = y
    return h.reshape(B, T, N, -1)


if __name__ == "__main__":
    # FC(input_dims=(4, 32), units=(32, 16), activations=(F.relu, None), ...)
    B, T, N, C_IN = 2, 8, 16, 4          # M = B*T*N = 256
    input_dims = (C_IN, 32)
    units = (32, 16)
    activations = (True, False)          # ReLU for layer 0, None for layer 1

    key = jax.random.PRNGKey(0)
    kx, kp, kx2 = jax.random.split(key, 3)
    x = jax.random.normal(kx, (B, T, N, C_IN), dtype=jnp.float32)
    params = init_fc_params(kp, input_dims, units)

    # 1) VMEM-resident fast path (M = 256 rows fit trivially).
    out = jax.block_until_ready(fc_forward(x, params, activations))
    ref = fc_reference(x, params, activations)
    assert out.shape == (B, T, N, units[-1])
    assert jnp.allclose(out, ref, rtol=1e-2, atol=1e-2), (
        f"max abs diff {jnp.max(jnp.abs(out - ref))}")

    # 2) Ragged M (M = 126) on the resident path exercises the row mask.
    x2 = jax.random.normal(kx2, (2, 7, 9, C_IN), dtype=jnp.float32)
    out2 = jax.block_until_ready(fc_forward(x2, params, activations))
    ref2 = fc_reference(x2, params, activations)
    assert out2.shape == (2, 7, 9, units[-1])
    assert jnp.allclose(out2, ref2, rtol=1e-2, atol=1e-2), (
        f"max abs diff {jnp.max(jnp.abs(out2 - ref2))}")

    # 3) Force the tiled (L+1)-phase fallback with a small tile to exercise
    #    the phase machinery, masked MXU stats, and lane-dense padded store.
    out3 = jax.block_until_ready(
        fc_forward(x2, params, activations, force_tiled=True, tm_target=64))
    assert jnp.allclose(out3, ref2, rtol=1e-2, atol=1e-2), (
        f"max abs diff {jnp.max(jnp.abs(out3 - ref2))}")

    print("KERNEL_OK")
</pallas_src>

<mosaic_0001>
module attributes {stable_mosaic.version = 11 : i64} {
  func.func @kernel(%arg0: i32, %arg1: memref<256x4xf32, #tpu.memory_space<vmem>>, %arg2: memref<4x128xf32, #tpu.memory_space<vmem>>, %arg3: memref<128x128xf32, #tpu.memory_space<vmem>>, %arg4: memref<1x128xf32, #tpu.memory_space<vmem>>, %arg5: memref<1x128xf32, #tpu.memory_space<vmem>>, %arg6: memref<1x128xf32, #tpu.memory_space<vmem>>, %arg7: memref<1x128xf32, #tpu.memory_space<vmem>>, %arg8: memref<256x128xf32, #tpu.memory_space<vmem>>) attributes {dimension_semantics = [#tpu.dimension_semantics<arbitrary>], iteration_bounds = array<i64: 1>, scalar_prefetch = 0 : i64, scratch_operands = 0 : i64, tpu.core_type = #tpu.core_type<tc>, window_params = [{pipeline_mode = #tpu.pipeline_mode<synchronous>, transform_indices = @transform_0, window_bounds = array<i64: 256, 4>}, {pipeline_mode = #tpu.pipeline_mode<synchronous>, transform_indices = @transform_1, window_bounds = array<i64: 4, 128>}, {pipeline_mode = #tpu.pipeline_mode<synchronous>, transform_indices = @transform_2, window_bounds = array<i64: 128, 128>}, {pipeline_mode = #tpu.pipeline_mode<synchronous>, transform_indices = @transform_3, window_bounds = array<i64: 1, 128>}, {pipeline_mode = #tpu.pipeline_mode<synchronous>, transform_indices = @transform_4, window_bounds = array<i64: 1, 128>}, {pipeline_mode = #tpu.pipeline_mode<synchronous>, transform_indices = @transform_5, window_bounds = array<i64: 1, 128>}, {pipeline_mode = #tpu.pipeline_mode<synchronous>, transform_indices = @transform_6, window_bounds = array<i64: 1, 128>}, {pipeline_mode = #tpu.pipeline_mode<synchronous>, transform_indices = @transform_7, window_bounds = array<i64: 256, 128>}]} {
    %cst = arith.constant 1.000000e+00 : f32
    %0 = vector.broadcast %cst : f32 to vector<1x256xf32>
    %c0 = arith.constant 0 : index
    %c0_0 = arith.constant 0 : index
    %1 = vector.load %arg1[%c0, %c0_0] : memref<256x4xf32, #tpu.memory_space<vmem>>, vector<256x4xf32>
    %c0_1 = arith.constant 0 : index
    %c0_2 = arith.constant 0 : index
    %2 = vector.load %arg2[%c0_1, %c0_2] : memref<4x128xf32, #tpu.memory_space<vmem>>, vector<4x128xf32>
    %cst_3 = arith.constant dense<0.000000e+00> : vector<256x128xf32>
    %3 = tpu.matmul %1, %2, %cst_3 {dimension_numbers = #tpu.dot_dimension_numbers<[1], [0], [0], [1], [0, 0, 1, 1], [], []>} : vector<256x4xf32>, vector<4x128xf32>, vector<256x128xf32> -> vector<256x128xf32>
    %cst_4 = arith.constant dense<0.000000e+00> : vector<1x128xf32>
    %4 = tpu.matmul %0, %3, %cst_4 {dimension_numbers = #tpu.dot_dimension_numbers<[1], [0], [0], [1], [0, 0, 1, 1], [], []>} : vector<1x256xf32>, vector<256x128xf32>, vector<1x128xf32> -> vector<1x128xf32>
    %cst_5 = arith.constant 3.906250e-03 : f32
    %5 = vector.broadcast %cst_5 : f32 to vector<1x128xf32>
    %6 = arith.mulf %4, %5 : vector<1x128xf32>
    %7 = vector.broadcast %6 : vector<1x128xf32> to vector<256x128xf32>
    %8 = arith.subf %3, %7 : vector<256x128xf32>
    %9 = arith.mulf %8, %8 : vector<256x128xf32>
    %cst_6 = arith.constant dense<0.000000e+00> : vector<1x128xf32>
    %10 = tpu.matmul %0, %9, %cst_6 {dimension_numbers = #tpu.dot_dimension_numbers<[1], [0], [0], [1], [0, 0, 1, 1], [], []>} : vector<1x256xf32>, vector<256x128xf32>, vector<1x128xf32> -> vector<1x128xf32>
    %cst_7 = arith.constant 3.906250e-03 : f32
    %11 = vector.broadcast %cst_7 : f32 to vector<1x128xf32>
    %12 = arith.mulf %10, %11 : vector<1x128xf32>
    %c0_8 = arith.constant 0 : index
    %c0_9 = arith.constant 0 : index
    %13 = vector.load %arg4[%c0_8, %c0_9] : memref<1x128xf32, #tpu.memory_space<vmem>>, vector<1x128xf32>
    %cst_10 = arith.constant 9.99999974E-6 : f32
    %14 = vector.broadcast %cst_10 : f32 to vector<1x128xf32>
    %15 = arith.addf %12, %14 : vector<1x128xf32>
    %16 = math.rsqrt %15 : vector<1x128xf32>
    %17 = arith.mulf %13, %16 : vector<1x128xf32>
    %c0_11 = arith.constant 0 : index
    %c0_12 = arith.constant 0 : index
    %18 = vector.load %arg6[%c0_11, %c0_12] : memref<1x128xf32, #tpu.memory_space<vmem>>, vector<1x128xf32>
    %19 = arith.mulf %6, %17 : vector<1x128xf32>
    %20 = arith.subf %18, %19 : vector<1x128xf32>
    %21 = vector.broadcast %17 : vector<1x128xf32> to vector<256x128xf32>
    %22 = arith.mulf %3, %21 : vector<256x128xf32>
    %23 = vector.broadcast %20 : vector<1x128xf32> to vector<256x128xf32>
    %24 = arith.addf %22, %23 : vector<256x128xf32>
    %cst_13 = arith.constant 0.000000e+00 : f32
    %25 = vector.broadcast %cst_13 : f32 to vector<256x128xf32>
    %26 = arith.maximumf %24, %25 : vector<256x128xf32>
    %c0_14 = arith.constant 0 : index
    %c0_15 = arith.constant 0 : index
    %27 = vector.load %arg3[%c0_14, %c0_15] : memref<128x128xf32, #tpu.memory_space<vmem>>, vector<128x128xf32>
    %cst_16 = arith.constant dense<0.000000e+00> : vector<256x128xf32>
    %28 = tpu.matmul %26, %27, %cst_16 {dimension_numbers = #tpu.dot_dimension_numbers<[1], [0], [0], [1], [0, 0, 1, 1], [], []>} : vector<256x128xf32>, vector<128x128xf32>, vector<256x128xf32> -> vector<256x128xf32>
    %cst_17 = arith.constant dense<0.000000e+00> : vector<1x128xf32>
    %29 = tpu.matmul %0, %28, %cst_17 {dimension_numbers = #tpu.dot_dimension_numbers<[1], [0], [0], [1], [0, 0, 1, 1], [], []>} : vector<1x256xf32>, vector<256x128xf32>, vector<1x128xf32> -> vector<1x128xf32>
    %cst_18 = arith.constant 3.906250e-03 : f32
    %30 = vector.broadcast %cst_18 : f32 to vector<1x128xf32>
    %31 = arith.mulf %29, %30 : vector<1x128xf32>
    %32 = vector.broadcast %31 : vector<1x128xf32> to vector<256x128xf32>
    %33 = arith.subf %28, %32 : vector<256x128xf32>
    %34 = arith.mulf %33, %33 : vector<256x128xf32>
    %cst_19 = arith.constant dense<0.000000e+00> : vector<1x128xf32>
    %35 = tpu.matmul %0, %34, %cst_19 {dimension_numbers = #tpu.dot_dimension_numbers<[1], [0], [0], [1], [0, 0, 1, 1], [], []>} : vector<1x256xf32>, vector<256x128xf32>, vector<1x128xf32> -> vector<1x128xf32>
    %cst_20 = arith.constant 3.906250e-03 : f32
    %36 = vector.broadcast %cst_20 : f32 to vector<1x128xf32>
    %37 = arith.mulf %35, %36 : vector<1x128xf32>
    %c0_21 = arith.constant 0 : index
    %c0_22 = arith.constant 0 : index
    %38 = vector.load %arg5[%c0_21, %c0_22] : memref<1x128xf32, #tpu.memory_space<vmem>>, vector<1x128xf32>
    %cst_23 = arith.constant 9.99999974E-6 : f32
    %39 = vector.broadcast %cst_23 : f32 to vector<1x128xf32>
    %40 = arith.addf %37, %39 : vector<1x128xf32>
    %41 = math.rsqrt %40 : vector<1x128xf32>
    %42 = arith.mulf %38, %41 : vector<1x128xf32>
    %c0_24 = arith.constant 0 : index
    %c0_25 = arith.constant 0 : index
    %43 = vector.load %arg7[%c0_24, %c0_25] : memref<1x128xf32, #tpu.memory_space<vmem>>, vector<1x128xf32>
    %44 = arith.mulf %31, %42 : vector<1x128xf32>
    %45 = arith.subf %43, %44 : vector<1x128xf32>
    %46 = vector.broadcast %42 : vector<1x128xf32> to vector<256x128xf32>
    %47 = arith.mulf %28, %46 : vector<256x128xf32>
    %48 = vector.broadcast %45 : vector<1x128xf32> to vector<256x128xf32>
    %49 = arith.addf %47, %48 : vector<256x128xf32>
    %c0_26 = arith.constant 0 : index
    %c0_27 = arith.constant 0 : index
    %50 = vector.load %arg8[%c0_26, %c0_27] : memref<256x128xf32, #tpu.memory_space<vmem>>, vector<256x128xf32>
    tpu.vector_store %arg8[%c0_26, %c0_27], %49 {strides = array<i32>} : memref<256x128xf32, #tpu.memory_space<vmem>>, vector<256x128xf32>,
    return
  }
  func.func @transform_0(%arg0: i32) -> (i32, i32) {
    %c0_i32 = arith.constant 0 : i32
    %c0_i32_0 = arith.constant 0 : i32
    %c0_i32_1 = arith.constant 0 : i32
    return %c0_i32, %c0_i32_0 : i32, i32
  }
  func.func @transform_1(%arg0: i32) -> (i32, i32) {
    %c0_i32 = arith.constant 0 : i32
    %c0_i32_0 = arith.constant 0 : i32
    %c0_i32_1 = arith.constant 0 : i32
    return %c0_i32, %c0_i32_0 : i32, i32
  }
  func.func @transform_2(%arg0: i32) -> (i32, i32) {
    %c0_i32 = arith.constant 0 : i32
    %c0_i32_0 = arith.constant 0 : i32
    %c0_i32_1 = arith.constant 0 : i32
    return %c0_i32, %c0_i32_0 : i32, i32
  }
  func.func @transform_3(%arg0: i32) -> (i32, i32) {
    %c0_i32 = arith.constant 0 : i32
    %c0_i32_0 = arith.constant 0 : i32
    %c0_i32_1 = arith.constant 0 : i32
    return %c0_i32, %c0_i32_0 : i32, i32
  }
  func.func @transform_4(%arg0: i32) -> (i32, i32) {
    %c0_i32 = arith.constant 0 : i32
    %c0_i32_0 = arith.constant 0 : i32
    %c0_i32_1 = arith.constant 0 : i32
    return %c0_i32, %c0_i32_0 : i32, i32
  }
  func.func @transform_5(%arg0: i32) -> (i32, i32) {
    %c0_i32 = arith.constant 0 : i32
    %c0_i32_0 = arith.constant 0 : i32
    %c0_i32_1 = arith.constant 0 : i32
    return %c0_i32, %c0_i32_0 : i32, i32
  }
  func.func @transform_6(%arg0: i32) -> (i32, i32) {
    %c0_i32 = arith.constant 0 : i32
    %c0_i32_0 = arith.constant 0 : i32
    %c0_i32_1 = arith.constant 0 : i32
    return %c0_i32, %c0_i32_0 : i32, i32
  }
  func.func @transform_7(%arg0: i32) -> (i32, i32) {
    %c0_i32 = arith.constant 0 : i32
    %c0_i32_0 = arith.constant 0 : i32
    %c0_i32_1 = arith.constant 0 : i32
    return %c0_i32, %c0_i32_0 : i32, i32
  }
}

</mosaic_0001>

<bundles_post_ra>
// kernel: tpu_custom_call.1
= control target key start
LH: loop header
LB: loop body
LE: loop exit
PB: predicated region body
PF: predicated region fallthrough
CT: control target
= control target key end

     0   :  { %vm157_vm0 = vcmask 1043456   ;;  %vm60_vm1 = vcmask 31744   ;;  %s1861_s0 = inlined_call_operand.vmem [shape: f32[256,4], index: 0, kind: input, shape index: {}]   ;;  %s1862_s1 = inlined_call_operand.vmem [shape: f32[4,128], index: 1, kind: input, shape index: {}]   ;;  %s1863_s2 = inlined_call_operand.vmem [shape: f32[128,128], index: 2, kind: input, shape index: {}]   ;;  %s1864_s3 = inlined_call_operand.vmem [shape: f32[1,128], index: 3, kind: input, shape index: {}]   ;;  %s1865_s4 = inlined_call_operand.vmem [shape: f32[1,128], index: 4, kind: input, shape index: {}]   ;;  %s1866_s5 = inlined_call_operand.vmem [shape: f32[1,128], index: 5, kind: input, shape index: {}]   ;;  %s1867_s6 = inlined_call_operand.vmem [shape: f32[1,128], index: 6, kind: input, shape index: {}]   ;;  %s1868_s7 = inlined_call_operand.hbm [shape: f32[256,128], index: 7, kind: output, shape index: {}]  }
   0x1   :  { %v59_v0 = vld [vmem:[%s1862_s1] sm:$0xf] }
   0x2   :  { %v27_v1 = vld [vmem:[%s1861_s0] sm:$0xff]  ;;  %951 = vmatpush.msk.msra.mxu0 %vm157_vm0, %v59_v0  ;;  %984 = vmatpush.msk.msra.mxu1 %vm157_vm0, %v59_v0 }
   0x3   :  { %952 = vmatmul.msk.f32.vlgmr.msra.gmra.mxu0 %vm60_vm1, %v27_v1 }
   0x4   :  { %12 = vsyncpa [#allocation3], 0  ;;  %v28_v2 = vld [vmem:[%s1861_s0 + $0x8] sm:$0xff]  ;;  %v29_v3 = vld [vmem:[%s1861_s0 + $0x10] sm:$0xff]  ;;  %v1035_v63 = vmov 1.0   ;;  %s939_s8 = sshll.u32 %s1868_s7, 4  ;;  %s940_s8 = int_to_ptr.hbm [resolvable:$true] %s939_s8 }
   0x5   :  { %v30_v4 = vld [vmem:[%s1861_s0 + $0x18] sm:$0xff]  ;;  %v31_v5 = vld [vmem:[%s1861_s0 + $0x20] sm:$0xff]  ;;  %v52_v6 = vld [vmem:[%s1861_s0 + $0xc8] sm:$0xff]  ;;  %s1037_s1 = smov 128   ;;  %s1038_s9 = smov 8  }
   0x6   :  { %977 = vmatmul.msk.f32.vlgmr.msra.gmra.mxu1 %vm60_vm1, %v52_v6  ;;  %v32_v7 = vld [vmem:[%s1861_s0 + $0x28] sm:$0xff]  ;;  %v53_v8 = vld [vmem:[%s1861_s0 + $0xd0] sm:$0xff]  ;;  %v54_v10 = vld [vmem:[%s1861_s0 + $0xd8] sm:$0xff] }
   0x7   :  { %v33_v9 = vld [vmem:[%s1861_s0 + $0x30] sm:$0xff]  ;;  %v34_v11 = vld [vmem:[%s1861_s0 + $0x38] sm:$0xff]  ;;  %v55_v12 = vld [vmem:[%s1861_s0 + $0xe0] sm:$0xff] }
   0x8   :  { %v35_v13 = vld [vmem:[%s1861_s0 + $0x40] sm:$0xff]  ;;  %v56_v14 = vld [vmem:[%s1861_s0 + $0xe8] sm:$0xff]  ;;  %v57_v16 = vld [vmem:[%s1861_s0 + $0xf0] sm:$0xff] }
   0x9   :  { %v36_v15 = vld [vmem:[%s1861_s0 + $0x48] sm:$0xff]  ;;  %v37_v17 = vld [vmem:[%s1861_s0 + $0x50] sm:$0xff]  ;;  %v58_v18 = vld [vmem:[%s1861_s0 + $0xf8] sm:$0xff] }
   0xa   :  { %v38_v19 = vld [vmem:[%s1861_s0 + $0x58] sm:$0xff]  ;;  %v39_v20 = vld [vmem:[%s1861_s0 + $0x60] sm:$0xff]  ;;  %v40_v21 = vld [vmem:[%s1861_s0 + $0x68] sm:$0xff] }
   0xb   :  { %953 = vmatmul.msk.f32.gmra.mxu0 %vm60_vm1, %v28_v2  ;;  %v41_v22 = vld [vmem:[%s1861_s0 + $0x70] sm:$0xff]  ;;  %v42_v23 = vld [vmem:[%s1861_s0 + $0x78] sm:$0xff]  ;;  %v43_v25 = vld [vmem:[%s1861_s0 + $0x80] sm:$0xff] }
   0xc   :  { %v44_v27 = vld [vmem:[%s1861_s0 + $0x88] sm:$0xff]  ;;  %v45_v29 = vld [vmem:[%s1861_s0 + $0x90] sm:$0xff]  ;;  %v46_v31 = vld [vmem:[%s1861_s0 + $0x98] sm:$0xff] }
   0xd   :  { %v47_v33 = vld [vmem:[%s1861_s0 + $0xa0] sm:$0xff]  ;;  %v48_v36 = vld [vmem:[%s1861_s0 + $0xa8] sm:$0xff]  ;;  %v49_v39 = vld [vmem:[%s1861_s0 + $0xb0] sm:$0xff] }
   0xe   :  { %978 = vmatmul.msk.f32.gmra.mxu1 %vm60_vm1, %v53_v8  ;;  %v50_v42 = vld [vmem:[%s1861_s0 + $0xb8] sm:$0xff]  ;;  %v51_v45 = vld [vmem:[%s1861_s0 + $0xc0] sm:$0xff] }
  0x13   :  { %954 = vmatmul.msk.f32.gmra.mxu0 %vm60_vm1, %v29_v3 }
  0x16   :  { %979 = vmatmul.msk.f32.gmra.mxu1 %vm60_vm1, %v54_v10 }
  0x1b   :  { %955 = vmatmul.msk.f32.gmra.mxu0 %vm60_vm1, %v30_v4 }
  0x1e   :  { %980 = vmatmul.msk.f32.gmra.mxu1 %vm60_vm1, %v55_v12 }
  0x23   :  { %956 = vmatmul.msk.f32.gmra.mxu0 %vm60_vm1, %v31_v5 }
  0x26   :  { %981 = vmatmul.msk.f32.gmra.mxu1 %vm60_vm1, %v56_v14 }
  0x2b   :  { %957 = vmatmul.msk.f32.gmra.mxu0 %vm60_vm1, %v32_v7 }
  0x2e   :  { %982 = vmatmul.msk.f32.gmra.mxu1 %vm60_vm1, %v57_v16 }
  0x33   :  { %958 = vmatmul.msk.f32.gmra.mxu0 %vm60_vm1, %v33_v9 }
  0x36   :  { %983 = vmatmul.msk.f32.gmra.mxu1 %vm60_vm1, %v58_v18 }
  0x3b   :  { %959 = vmatmul.msk.f32.gmra.mxu0 %vm60_vm1, %v34_v11 }
  0x43   :  { %960 = vmatmul.msk.f32.gmra.mxu0 %vm60_vm1, %v35_v13 }
  0x4b   :  { %961 = vmatmul.msk.f32.gmra.mxu0 %vm60_vm1, %v36_v15 }
  0x53   :  { %962 = vmatmul.msk.f32.gmra.mxu0 %vm60_vm1, %v37_v17 }
  0x5b   :  { %963 = vmatmul.msk.f32.gmra.mxu0 %vm60_vm1, %v38_v19 }
  0x63   :  { %964 = vmatmul.msk.f32.gmra.mxu0 %vm60_vm1, %v39_v20 }
  0x6b   :  { %965 = vmatmul.msk.f32.gmra.mxu0 %vm60_vm1, %v40_v21 }
  0x73   :  { %966 = vmatmul.msk.f32.gmra.mxu0 %vm60_vm1, %v41_v22 }
  0x7b   :  { %967 = vmatmul.msk.f32.gmra.mxu0 %vm60_vm1, %v42_v23 }
  0x80   :  { %v1174_v24 = vpop.f32.mrf.mxu0 }
  0x83   :  { %968 = vmatmul.msk.f32.gmra.mxu0 %vm60_vm1, %v43_v25  ;;  %v1204_v34 = vpop.f32.mrf.mxu1 }
  0x88   :  { %v1180_v26 = vpop.f32.mrf.mxu0 }
  0x8b   :  { %969 = vmatmul.msk.f32.gmra.mxu0 %vm60_vm1, %v44_v27  ;;  %v1212_v37 = vpop.f32.mrf.mxu1 }
  0x90   :  { %v1186_v28 = vpop.f32.mrf.mxu0 }
  0x93   :  { %970 = vmatmul.msk.f32.gmra.mxu0 %vm60_vm1, %v45_v29  ;;  %v1220_v40 = vpop.f32.mrf.mxu1 }
  0x98   :  { %v1192_v30 = vpop.f32.mrf.mxu0 }
  0x9b   :  { %971 = vmatmul.msk.f32.gmra.mxu0 %vm60_vm1, %v46_v31  ;;  %v1228_v43 = vpop.f32.mrf.mxu1 }
  0xa0   :  { %v1198_v32 = vpop.f32.mrf.mxu0 }
  0xa3   :  { %972 = vmatmul.msk.f32.gmra.mxu0 %vm60_vm1, %v47_v33  ;;  %v1236_v46 = vpop.f32.mrf.mxu1 }
  0xa8   :  { %v1206_v35 = vpop.f32.mrf.mxu0 }
  0xab   :  { %973 = vmatmul.msk.f32.gmra.mxu0 %vm60_vm1, %v48_v36  ;;  %v1240_v48 = vpop.f32.mrf.mxu1 }
  0xb0   :  { %v1214_v38 = vpop.f32.mrf.mxu0 }
  0xb3   :  { %974 = vmatmul.msk.f32.gmra.mxu0 %vm60_vm1, %v49_v39  ;;  %v1244_v50 = vpop.f32.mrf.mxu1 }
  0xb4   :  { %294 = vmatpush.msra.mxu2 %v1244_v50 }
  0xb6   :  { %295 = vmatpush.msra.mxu2 %v1240_v48 }
  0xb8   :  { %v1222_v41 = vpop.f32.mrf.mxu0  ;;  %296 = vmatpush.msra.mxu2 %v1236_v46 }
  0xba   :  { %297 = vmatpush.msra.mxu2 %v1228_v43 }
  0xbb   :  { %975 = vmatmul.msk.f32.gmra.mxu0 %vm60_vm1, %v50_v42 }
  0xbc   :  { %298 = vmatpush.msra.mxu2 %v1220_v40 }
  0xbe   :  { %299 = vmatpush.msra.mxu2 %v1212_v37 }
  0xc0   :  { %v1230_v44 = vpop.f32.mrf.mxu0  ;;  %300 = vmatpush.msra.mxu2 %v1204_v34 }
  0xc3   :  { %976 = vmatmul.msk.f32.gmra.mxu0 %vm60_vm1, %v51_v45 }
  0xc8   :  { %v1238_v47 = vpop.f32.mrf.mxu0 }
  0xd0   :  { %v1242_v49 = vpop.f32.mrf.mxu0 }
  0xd8   :  { %v1248_v51 = vpop.f32.mrf.mxu0 }
  0xe0   :  { %v1254_v52 = vpop.f32.mrf.mxu0 }
  0xe8   :  { %v1257_v53 = vpop.f32.mrf.mxu0 }
  0xf0   :  { %v1259_v54 = vpop.f32.mrf.mxu0 }
  0xf8   :  { %v1261_v55 = vpop.f32.mrf.mxu0 }
  0xf9   :  { %274 = vmatpush.msrb.mxu1 %v1261_v55 }
  0xfb   :  { %275 = vmatpush.msrb.mxu1 %v1259_v54 }
  0xfd   :  { %276 = vmatpush.msrb.mxu1 %v1257_v53 }
  0xff   :  { %277 = vmatpush.msrb.mxu1 %v1254_v52 }
 0x100   :  { %v1267_v56 = vpop.f32.mrf.mxu0 }
 0x101   :  { %278 = vmatpush.msrb.mxu1 %v1248_v51 }
 0x103   :  { %279 = vmatpush.msrb.mxu1 %v1242_v49 }
 0x105   :  { %280 = vmatpush.msrb.mxu1 %v1238_v47 }
 0x107   :  { %281 = vmatpush.msrb.mxu1 %v1230_v44 }
 0x108   :  { %v1273_v57 = vpop.f32.mrf.mxu0 }
 0x109   :  { %282 = vmatpush.msrb.mxu1 %v1222_v41 }
 0x10b   :  { %283 = vmatpush.msrb.mxu1 %v1214_v38 }
 0x10d   :  { %284 = vmatpush.msrb.mxu1 %v1206_v35 }
 0x10f   :  { %285 = vmatpush.msrb.mxu1 %v1198_v32 }
 0x110   :  { %v1279_v58 = vpop.f32.mrf.mxu0 }
 0x111   :  { %286 = vmatpush.msrb.mxu1 %v1192_v30 }
 0x113   :  { %287 = vmatpush.msrb.mxu1 %v1186_v28 }
 0x115   :  { %288 = vmatpush.msrb.mxu1 %v1180_v26 }
 0x117   :  { %289 = vmatpush.msrb.mxu1 %v1174_v24 }
 0x118   :  { %v1285_v59 = vpop.f32.mrf.mxu0  ;;  %290 = vmatmul.f32.vlgmr.msrb.gmra.mxu1 %v1035_v63 }
 0x120   :  { %v1287_v60 = vpop.f32.mrf.mxu0 }
 0x128   :  { %v1289_v61 = vpop.f32.mrf.mxu0 }
 0x130   :  { %v1291_v62 = vpop.f32.mrf.mxu0 }
 0x138   :  { %v1294_v0 = vpop.f32.mrf.mxu0 }
 0x140   :  { %v1296_v1 = vpop.f32.mrf.mxu0 }
 0x141   :  { %301 = vmatpush.msra.mxu2 %v1296_v1 }
 0x143   :  { %302 = vmatpush.msra.mxu2 %v1294_v0 }
 0x145   :  { %303 = vmatpush.msra.mxu2 %v1291_v62 }
 0x147   :  { %304 = vmatpush.msra.mxu2 %v1289_v61 }
 0x149   :  { %305 = vmatpush.msra.mxu2 %v1287_v60 }
 0x14b   :  { %306 = vmatpush.msra.mxu2 %v1285_v59 }
 0x14d   :  { %307 = vmatpush.msra.mxu2 %v1279_v58 }
 0x14f   :  { %308 = vmatpush.msra.mxu2 %v1273_v57 }
 0x151   :  { %309 = vmatpush.msra.mxu2 %v1267_v56 }
 0x152   :  { %310 = vmatmul.f32.vlgmr.msra.gmra.mxu2 %v1035_v63 }
 0x195   :  { %v291_v2 = vpop.f32.mrf.mxu1 }
 0x1d5   :  { %v311_v3 = vpop.f32.mrf.mxu2 }
 0x1d6   :  { %v312_v4 = vadd.f32 %v311_v3, %v291_v2 }
 0x1d8   :  { %v1308_v5 = vmul.f32 0.00390625, %v312_v4 }
 0x1da   :  { %v1311_v6 = vperm.slane %v1308_v5, 0 }
 0x1dc   :  { %v331_v7 = vsub.f32 %v1261_v55, %v1311_v6  ;;  %v330_v8 = vsub.f32 %v1259_v54, %v1311_v6  ;;  %v329_v9 = vsub.f32 %v1257_v53, %v1311_v6  ;;  %v328_v11 = vsub.f32 %v1254_v52, %v1311_v6 }
 0x1dd   :  { %v327_v13 = vsub.f32 %v1248_v51, %v1311_v6  ;;  %v326_v15 = vsub.f32 %v1242_v49, %v1311_v6  ;;  %v325_v17 = vsub.f32 %v1238_v47, %v1311_v6  ;;  %v324_v19 = vsub.f32 %v1230_v44, %v1311_v6 }
 0x1de   :  { %v363_v10 = vmul.f32 %v331_v7, %v331_v7  ;;  %v362_v12 = vmul.f32 %v330_v8, %v330_v8  ;;  %v361_v14 = vmul.f32 %v329_v9, %v329_v9  ;;  %v360_v16 = vmul.f32 %v328_v11, %v328_v11 }
 0x1df   :  { %v359_v18 = vmul.f32 %v327_v13, %v327_v13  ;;  %v358_v20 = vmul.f32 %v326_v15, %v326_v15  ;;  %v323_v21 = vsub.f32 %v1222_v41, %v1311_v6  ;;  %v357_v22 = vmul.f32 %v325_v17, %v325_v17 }
 0x1e0   :  { %380 = vmatpush.msra.mxu1 %v363_v10  ;;  %v322_v23 = vsub.f32 %v1214_v38, %v1311_v6  ;;  %v356_v25 = vmul.f32 %v324_v19, %v324_v19  ;;  %v321_v27 = vsub.f32 %v1206_v35, %v1311_v6  ;;  %v320_v31 = vsub.f32 %v1198_v32, %v1311_v6 }
 0x1e1   :  { %v355_v29 = vmul.f32 %v323_v21, %v323_v21  ;;  %v319_v36 = vsub.f32 %v1192_v30, %v1311_v6  ;;  %v318_v42 = vsub.f32 %v1186_v28, %v1311_v6  ;;  %v317_v2 = vsub.f32 %v1180_v26, %v1311_v6 }
 0x1e2   :  { %381 = vmatpush.msra.mxu1 %v362_v12  ;;  %v354_v33 = vmul.f32 %v322_v23, %v322_v23  ;;  %v353_v39 = vmul.f32 %v321_v27, %v321_v27  ;;  %v352_v45 = vmul.f32 %v320_v31, %v320_v31  ;;  %v316_v7 = vsub.f32 %v1174_v24, %v1311_v6 }
 0x1e3   :  { %v351_v3 = vmul.f32 %v319_v36, %v319_v36  ;;  %v350_v4 = vmul.f32 %v318_v42, %v318_v42  ;;  %v347_v8 = vsub.f32 %v1244_v50, %v1311_v6  ;;  %v349_v9 = vmul.f32 %v317_v2, %v317_v2 }
 0x1e4   :  { %382 = vmatpush.msra.mxu1 %v361_v14  ;;  %v346_v10 = vsub.f32 %v1240_v48, %v1311_v6  ;;  %v348_v11 = vmul.f32 %v316_v7, %v316_v7  ;;  %v345_v12 = vsub.f32 %v1236_v46, %v1311_v6  ;;  %v344_v14 = vsub.f32 %v1228_v43, %v1311_v6 }
 0x1e5   :  { %v379_v13 = vmul.f32 %v347_v8, %v347_v8  ;;  %v333_v7 = vsub.f32 %v1273_v57, %v1311_v6 }
 0x1e6   :  { %383 = vmatpush.msra.mxu1 %v360_v16  ;;  %v378_v15 = vmul.f32 %v346_v10, %v346_v10  ;;  %v343_v16 = vsub.f32 %v1220_v40, %v1311_v6  ;;  %v377_v17 = vmul.f32 %v345_v12, %v345_v12  ;;  %v376_v19 = vmul.f32 %v344_v14, %v344_v14  ;;  %v553_v14 = vld [vmem:[%s1863_s2 + $0x70] sm:$0xff] }
 0x1e8   :  { %384 = vmatpush.msra.mxu1 %v359_v18  ;;  %v342_v18 = vsub.f32 %v1212_v37, %v1311_v6  ;;  %v375_v21 = vmul.f32 %v343_v16, %v343_v16  ;;  %v550_v16 = vld [vmem:[%s1863_s2 + $0x58] sm:$0xff] }
 0x1ea   :  { %385 = vmatpush.msra.mxu1 %v358_v20  ;;  %v341_v20 = vsub.f32 %v1204_v34, %v1311_v6  ;;  %v374_v23 = vmul.f32 %v342_v18, %v342_v18  ;;  %v549_v18 = vld [vmem:[%s1863_s2 + $0x50] sm:$0xff] }
 0x1ec   :  { %386 = vmatpush.msra.mxu1 %v357_v22  ;;  %v340_v22 = vsub.f32 %v1296_v1, %v1311_v6  ;;  %v373_v27 = vmul.f32 %v341_v20, %v341_v20  ;;  %v547_v20 = vld [vmem:[%s1863_s2 + $0x40] sm:$0xff] }
 0x1ee   :  { %387 = vmatpush.msra.mxu1 %v356_v25  ;;  %v339_v25 = vsub.f32 %v1294_v0, %v1311_v6  ;;  %v372_v31 = vmul.f32 %v340_v22, %v340_v22  ;;  %v545_v22 = vld [vmem:[%s1863_s2 + $0x30] sm:$0xff] }
 0x1f0   :  { %388 = vmatpush.msra.mxu1 %v355_v29  ;;  %v338_v29 = vsub.f32 %v1291_v62, %v1311_v6  ;;  %v371_v36 = vmul.f32 %v339_v25, %v339_v25 }
 0x1f2   :  { %389 = vmatpush.msra.mxu1 %v354_v33  ;;  %v337_v33 = vsub.f32 %v1289_v61, %v1311_v6  ;;  %v370_v42 = vmul.f32 %v338_v29, %v338_v29 }
 0x1f4   :  { %390 = vmatpush.msra.mxu1 %v353_v39  ;;  %v336_v39 = vsub.f32 %v1287_v60, %v1311_v6  ;;  %v369_v2 = vmul.f32 %v337_v33, %v337_v33 }
 0x1f6   :  { %391 = vmatpush.msra.mxu1 %v352_v45  ;;  %v335_v45 = vsub.f32 %v1285_v59, %v1311_v6 }
 0x1f8   :  { %392 = vmatpush.msra.mxu1 %v351_v3  ;;  %v334_v3 = vsub.f32 %v1279_v58, %v1311_v6  ;;  %v367_v8 = vmul.f32 %v335_v45, %v335_v45  ;;  %v539_v45 = vld [vmem:[%s1863_s2] sm:$0xff] }
 0x1fa   :  { %393 = vmatpush.msra.mxu1 %v350_v4  ;;  %v368_v4 = vmul.f32 %v336_v39, %v336_v39  ;;  %v366_v10 = vmul.f32 %v334_v3, %v334_v3  ;;  %v541_v39 = vld [vmem:[%s1863_s2 + $0x10] sm:$0xff] }
 0x1fc   :  { %394 = vmatpush.msra.mxu1 %v349_v9  ;;  %v332_v9 = vsub.f32 %v1267_v56, %v1311_v6  ;;  %v552_v6 = vld [vmem:[%s1863_s2 + $0x68] sm:$0xff] }
 0x1fe   :  { %395 = vmatpush.msra.mxu1 %v348_v11  ;;  %v365_v11 = vmul.f32 %v333_v7, %v333_v7  ;;  %v364_v12 = vmul.f32 %v332_v9, %v332_v9  ;;  %v421_v9 = vld [vmem:[%s1864_s3] sm:$0x1] }
 0x1ff   :  { %396 = vmatmul.f32.vlgmr.msra.gmra.mxu1 %v1035_v63 }
 0x200   :  { %400 = vmatpush.msrb.mxu1 %v379_v13  ;;  %v554_v13 = vld [vmem:[%s1863_s2 + $0x78] sm:$0xff] }
 0x201   :  { %555 = vmatpush.msrb.mxu2 %v554_v13  ;;  %985 = vmatpush.msra.mxu3 %v554_v13  ;;  %v434_v13 = vld [vmem:[%s1866_s5] sm:$0x1] }
 0x202   :  { %401 = vmatpush.msrb.mxu1 %v378_v15  ;;  %v551_v15 = vld [vmem:[%s1863_s2 + $0x60] sm:$0xff] }
 0x203   :  { %556 = vmatpush.msrb.mxu2 %v553_v14  ;;  %986 = vmatpush.msra.mxu3 %v553_v14 }
 0x204   :  { %402 = vmatpush.msrb.mxu1 %v377_v17 }
 0x205   :  { %557 = vmatpush.msrb.mxu2 %v552_v6  ;;  %987 = vmatpush.msra.mxu3 %v552_v6 }
 0x206   :  { %403 = vmatpush.msrb.mxu1 %v376_v19  ;;  %v548_v19 = vld [vmem:[%s1863_s2 + $0x48] sm:$0xff] }
 0x207   :  { %558 = vmatpush.msrb.mxu2 %v551_v15  ;;  %988 = vmatpush.msra.mxu3 %v551_v15 }
 0x208   :  { %404 = vmatpush.msrb.mxu1 %v375_v21  ;;  %v546_v21 = vld [vmem:[%s1863_s2 + $0x38] sm:$0xff] }
 0x209   :  { %559 = vmatpush.msrb.mxu2 %v550_v16  ;;  %989 = vmatpush.msra.mxu3 %v550_v16 }
 0x20a   :  { %405 = vmatpush.msrb.mxu1 %v374_v23 }
 0x20b   :  { %560 = vmatpush.msrb.mxu2 %v549_v18  ;;  %990 = vmatpush.msra.mxu3 %v549_v18 }
 0x20c   :  { %406 = vmatpush.msrb.mxu1 %v373_v27  ;;  %v544_v27 = vld [vmem:[%s1863_s2 + $0x28] sm:$0xff] }
 0x20d   :  { %561 = vmatpush.msrb.mxu2 %v548_v19  ;;  %991 = vmatpush.msra.mxu3 %v548_v19 }
 0x20e   :  { %407 = vmatpush.msrb.mxu1 %v372_v31  ;;  %v543_v31 = vld [vmem:[%s1863_s2 + $0x20] sm:$0xff] }
 0x20f   :  { %562 = vmatpush.msrb.mxu2 %v547_v20  ;;  %992 = vmatpush.msra.mxu3 %v547_v20 }
 0x210   :  { %408 = vmatpush.msrb.mxu1 %v371_v36  ;;  %v542_v36 = vld [vmem:[%s1863_s2 + $0x18] sm:$0xff] }
 0x211   :  { %563 = vmatpush.msrb.mxu2 %v546_v21  ;;  %993 = vmatpush.msra.mxu3 %v546_v21 }
 0x212   :  { %409 = vmatpush.msrb.mxu1 %v370_v42  ;;  %v540_v42 = vld [vmem:[%s1863_s2 + $0x8] sm:$0xff] }
 0x213   :  { %564 = vmatpush.msrb.mxu2 %v545_v22  ;;  %994 = vmatpush.msra.mxu3 %v545_v22 }
 0x214   :  { %410 = vmatpush.msrb.mxu1 %v369_v2 }
 0x215   :  { %565 = vmatpush.msrb.mxu2 %v544_v27  ;;  %995 = vmatpush.msra.mxu3 %v544_v27 }
 0x216   :  { %411 = vmatpush.msrb.mxu1 %v368_v4 }
 0x217   :  { %566 = vmatpush.msrb.mxu2 %v543_v31  ;;  %996 = vmatpush.msra.mxu3 %v543_v31 }
 0x218   :  { %412 = vmatpush.msrb.mxu1 %v367_v8 }
 0x219   :  { %567 = vmatpush.msrb.mxu2 %v542_v36  ;;  %997 = vmatpush.msra.mxu3 %v542_v36 }
 0x21a   :  { %413 = vmatpush.msrb.mxu1 %v366_v10 }
 0x21b   :  { %568 = vmatpush.msrb.mxu2 %v541_v39  ;;  %998 = vmatpush.msra.mxu3 %v541_v39 }
 0x21c   :  { %414 = vmatpush.msrb.mxu1 %v365_v11 }
 0x21d   :  { %569 = vmatpush.msrb.mxu2 %v540_v42  ;;  %999 = vmatpush.msra.mxu3 %v540_v42 }
 0x21e   :  { %415 = vmatpush.msrb.mxu1 %v364_v12 }
 0x21f   :  { %416 = vmatmul.f32.vlgmr.msrb.gmra.mxu1 %v1035_v63  ;;  %570 = vmatpush.msrb.mxu2 %v539_v45 }
 0x220   :  { %1000 = vmatpush.msra.mxu3 %v539_v45 }
 0x27c   :  { %v397_v17 = vpop.f32.mrf.mxu1 }
 0x29c   :  { %v417_v23 = vpop.f32.mrf.mxu1 }
 0x29d   :  { %v418_v25 = vadd.f32 %v417_v23, %v397_v17 }
 0x29f   :  { %v420_v29 = vmul.f32 0.00390625, %v418_v25 }
 0x2a1   :  { %v422_v33 = vadd.f32 1e-05, %v420_v29 }
 0x2a3   :  { %1005 = vrsqrt.f32 %v422_v33  ;;  %vm429_vm3 = vweird.f32 %v422_v33 }
 0x2a9   :  { %v1006_v2 = vpop.eup %1005 }
 0x2aa   :  { %v424_v3 = vmul.f32 %v1006_v2, %v422_v33  ;;  %vm430_vm2 = vweird.f32 %v1006_v2 }
 0x2ab   :  { %vm431_vm4 = vmor %vm429_vm3, %vm430_vm2 }
 0x2ac   :  { %v425_v4 = vmul.f32 %v1006_v2, %v424_v3 }
 0x2ae   :  { %v426_v7 = vmul.f32 0.5, %v425_v4 }
 0x2b0   :  { %v427_v8 = vsub.f32 1.5, %v426_v7 }
 0x2b2   :  { %v428_v10 = vmul.f32 %v1006_v2, %v427_v8 }
 0x2b4   :  { %v432_v11 = vsel %vm431_vm4, %v1006_v2, %v428_v10 }
 0x2b5   :  { %v433_v12 = vmul.f32 %v432_v11, %v421_v9 }
 0x2b7   :  { %v435_v14 = vmul.f32 %v433_v12, %v1308_v5  ;;  %v1434_v15 = vperm.slane %v433_v12, 0 }
 0x2b9   :  { %v436_v6 = vsub.f32 %v434_v13, %v435_v14  ;;  %v440_v17 = vmul.f32 %v1434_v15, %v1174_v24  ;;  %v458_v18 = vmul.f32 %v1434_v15, %v1279_v58  ;;  %v441_v5 = vmul.f32 %v1434_v15, %v1180_v26 }
 0x2ba   :  { %v442_v23 = vmul.f32 %v1434_v15, %v1186_v28  ;;  %v459_v25 = vmul.f32 %v1434_v15, %v1285_v59  ;;  %v448_v24 = vmul.f32 %v1434_v15, %v1230_v44  ;;  %v449_v58 = vmul.f32 %v1434_v15, %v1238_v47 }
 0x2bb   :  { %v1436_v16 = vperm.slane %v436_v6, 0  ;;  %v450_v27 = vmul.f32 %v1434_v15, %v1242_v49  ;;  %v451_v26 = vmul.f32 %v1434_v15, %v1248_v51  ;;  %v452_v28 = vmul.f32 %v1434_v15, %v1254_v52 }
 0x2bc   :  { %v466_v59 = vmul.f32 %v1434_v15, %v1212_v37  ;;  %v453_v44 = vmul.f32 %v1434_v15, %v1257_v53  ;;  %v454_v47 = vmul.f32 %v1434_v15, %v1259_v54  ;;  %v467_v49 = vmul.f32 %v1434_v15, %v1220_v40 }
 0x2bd   :  { %v475_v19 = vadd.f32 %v1436_v16, %v440_v17  ;;  %v493_v20 = vadd.f32 %v1436_v16, %v458_v18  ;;  %v476_v29 = vadd.f32 %v1436_v16, %v441_v5  ;;  %v494_v31 = vadd.f32 %v1436_v16, %v459_v25 }
 0x2be   :  { %v468_v51 = vmul.f32 %v1434_v15, %v1228_v43  ;;  %v469_v52 = vmul.f32 %v1434_v15, %v1236_v46  ;;  %v470_v37 = vmul.f32 %v1434_v15, %v1240_v48  ;;  %v1477_v33 = vadd.f32 %v1436_v16, %v448_v24 }
 0x2bf   :  { %v507_v21 = vmax.f32 %v475_v19, 0.0  ;;  %v525_v22 = vmax.f32 %v493_v20, 0.0  ;;  %v1480_v53 = vadd.f32 %v1436_v16, %v466_v59  ;;  %v1483_v54 = vadd.f32 %v1436_v16, %v449_v58 }
 0x2c0   :  { %v1486_v40 = vadd.f32 %v1436_v16, %v467_v49  ;;  %v1489_v43 = vadd.f32 %v1436_v16, %v450_v27  ;;  %v1492_v46 = vadd.f32 %v1436_v16, %v468_v51  ;;  %v508_v36 = vmax.f32 %v476_v29, 0.0 }
 0x2c1   :  { %571 = vmatmul.f32.vlgmr.msrb.gmra.mxu2 %v507_v21  ;;  %625 = vmatmul.f32.vlgmr.msra.gmra.mxu3 %v525_v22  ;;  %v526_v48 = vmax.f32 %v494_v31, 0.0  ;;  %v1495_v39 = vadd.f32 %v1436_v16, %v451_v26  ;;  %v1498_v42 = vadd.f32 %v1436_v16, %v469_v52  ;;  %v455_v45 = vmul.f32 %v1434_v15, %v1261_v55 }
 0x2c2   :  { %v456_v2 = vmul.f32 %v1434_v15, %v1267_v56  ;;  %v457_v3 = vmul.f32 %v1434_v15, %v1273_v57  ;;  %v471_v4 = vmul.f32 %v1434_v15, %v1244_v50  ;;  %v460_v7 = vmul.f32 %v1434_v15, %v1287_v60 }
 0x2c3   :  { %v1511_v8 = vadd.f32 %v1436_v16, %v452_v28  ;;  %v1514_v9 = vadd.f32 %v1436_v16, %v470_v37  ;;  %v1517_v55 = vadd.f32 %v1436_v16, %v453_v44  ;;  %v1523_v57 = vadd.f32 %v1436_v16, %v454_v47 }
 0x2c4   :  { %v1520_v56 = vadd.f32 %v1436_v16, %v471_v4  ;;  %v1526_v50 = vadd.f32 %v1436_v16, %v455_v45  ;;  %v477_v60 = vadd.f32 %v1436_v16, %v442_v23  ;;  %v495_v10 = vadd.f32 %v1436_v16, %v460_v7 }
 0x2c5   :  { %v1531_v11 = vadd.f32 %v1436_v16, %v456_v2  ;;  %v1534_v12 = vadd.f32 %v1436_v16, %v457_v3  ;;  %v443_v6 = vmul.f32 %v1434_v15, %v1192_v30  ;;  %v461_v17 = vmul.f32 %v1434_v15, %v1289_v61 }
 0x2c6   :  { %v509_v13 = vmax.f32 %v477_v60, 0.0  ;;  %v527_v14 = vmax.f32 %v495_v10, 0.0  ;;  %v444_v22 = vmul.f32 %v1434_v15, %v1198_v32  ;;  %v462_v5 = vmul.f32 %v1434_v15, %v1291_v62 }
 0x2c7   :  { %v478_v18 = vadd.f32 %v1436_v16, %v443_v6  ;;  %v496_v19 = vadd.f32 %v1436_v16, %v461_v17  ;;  %v445_v24 = vmul.f32 %v1434_v15, %v1206_v35  ;;  %v463_v58 = vmul.f32 %v1434_v15, %v1294_v0 }
 0x2c8   :  { %v479_v30 = vadd.f32 %v1436_v16, %v444_v22  ;;  %v497_v61 = vadd.f32 %v1436_v16, %v462_v5  ;;  %v446_v28 = vmul.f32 %v1434_v15, %v1214_v38  ;;  %v464_v59 = vmul.f32 %v1434_v15, %v1296_v1 }
 0x2c9   :  { %574 = vmatmul.f32.gmra.mxu2 %v508_v36  ;;  %628 = vmatmul.f32.gmra.mxu3 %v526_v48  ;;  %v510_v20 = vmax.f32 %v478_v18, 0.0  ;;  %v528_v21 = vmax.f32 %v496_v19, 0.0  ;;  %v480_v32 = vadd.f32 %v1436_v16, %v445_v24  ;;  %v498_v62 = vadd.f32 %v1436_v16, %v463_v58 }
 0x2ca   :  { %v511_v23 = vmax.f32 %v479_v30, 0.0  ;;  %v529_v25 = vmax.f32 %v497_v61, 0.0  ;;  %v481_v35 = vadd.f32 %v1436_v16, %v446_v28  ;;  %v499_v0 = vadd.f32 %v1436_v16, %v464_v59 }
 0x2cb   :  { %v512_v27 = vmax.f32 %v480_v32, 0.0  ;;  %v530_v26 = vmax.f32 %v498_v62, 0.0  ;;  %v447_v44 = vmul.f32 %v1434_v15, %v1222_v41  ;;  %v465_v47 = vmul.f32 %v1434_v15, %v1204_v34 }
 0x2cc   :  { %v513_v29 = vmax.f32 %v481_v35, 0.0  ;;  %v531_v31 = vmax.f32 %v499_v0, 0.0  ;;  %v515_v52 = vmax.f32 %v1477_v33, 0.0  ;;  %v533_v37 = vmax.f32 %v1480_v53, 0.0 }
 0x2cd   :  { %v482_v38 = vadd.f32 %v1436_v16, %v447_v44  ;;  %v500_v1 = vadd.f32 %v1436_v16, %v465_v47  ;;  %v516_v41 = vmax.f32 %v1483_v54, 0.0  ;;  %v534_v34 = vmax.f32 %v1486_v40, 0.0 }
 0x2ce   :  { %v517_v15 = vmax.f32 %v1489_v43, 0.0  ;;  %v535_v16 = vmax.f32 %v1492_v46, 0.0  ;;  %v518_v36 = vmax.f32 %v1495_v39, 0.0  ;;  %v536_v33 = vmax.f32 %v1498_v42, 0.0 }
 0x2cf   :  { %v514_v49 = vmax.f32 %v482_v38, 0.0  ;;  %v532_v51 = vmax.f32 %v500_v1, 0.0  ;;  %v519_v53 = vmax.f32 %v1511_v8, 0.0  ;;  %v537_v54 = vmax.f32 %v1514_v9, 0.0 }
 0x2d0   :  { %v520_v40 = vmax.f32 %v1517_v55, 0.0  ;;  %v538_v43 = vmax.f32 %v1520_v56, 0.0  ;;  %v521_v46 = vmax.f32 %v1523_v57, 0.0  ;;  %v522_v48 = vmax.f32 %v1526_v50, 0.0 }
 0x2d1   :  { %577 = vmatmul.f32.gmra.mxu2 %v509_v13  ;;  %631 = vmatmul.f32.gmra.mxu3 %v527_v14  ;;  %v523_v39 = vmax.f32 %v1531_v11, 0.0  ;;  %v524_v2 = vmax.f32 %v1534_v12, 0.0 }
 0x2d9   :  { %580 = vmatmul.f32.gmra.mxu2 %v510_v20  ;;  %634 = vmatmul.f32.gmra.mxu3 %v528_v21 }
 0x2e1   :  { %583 = vmatmul.f32.gmra.mxu2 %v511_v23  ;;  %637 = vmatmul.f32.gmra.mxu3 %v529_v25 }
 0x2e9   :  { %586 = vmatmul.f32.gmra.mxu2 %v512_v27  ;;  %640 = vmatmul.f32.gmra.mxu3 %v530_v26 }
 0x2f1   :  { %589 = vmatmul.f32.gmra.mxu2 %v513_v29  ;;  %643 = vmatmul.f32.gmra.mxu3 %v531_v31 }
 0x2f9   :  { %592 = vmatmul.f32.gmra.mxu2 %v514_v49  ;;  %646 = vmatmul.f32.gmra.mxu3 %v532_v51 }
 0x301   :  { %595 = vmatmul.f32.gmra.mxu2 %v515_v52  ;;  %649 = vmatmul.f32.gmra.mxu3 %v533_v37 }
 0x309   :  { %598 = vmatmul.f32.gmra.mxu2 %v516_v41  ;;  %652 = vmatmul.f32.gmra.mxu3 %v534_v34 }
 0x311   :  { %601 = vmatmul.f32.gmra.mxu2 %v517_v15  ;;  %655 = vmatmul.f32.gmra.mxu3 %v535_v16 }
 0x319   :  { %604 = vmatmul.f32.gmra.mxu2 %v518_v36  ;;  %658 = vmatmul.f32.gmra.mxu3 %v536_v33 }
 0x321   :  { %607 = vmatmul.f32.gmra.mxu2 %v519_v53  ;;  %661 = vmatmul.f32.gmra.mxu3 %v537_v54 }
 0x329   :  { %610 = vmatmul.f32.gmra.mxu2 %v520_v40  ;;  %664 = vmatmul.f32.gmra.mxu3 %v538_v43 }
 0x331   :  { %613 = vmatmul.f32.gmra.mxu2 %v521_v46 }
 0x339   :  { %616 = vmatmul.f32.gmra.mxu2 %v522_v48 }
 0x341   :  { %619 = vmatmul.f32.gmra.mxu2 %v523_v39 }
 0x344   :  { %v1581_v42 = vpop.f32.mrf.mxu2  ;;  %v1583_v45 = vpop.f32.mrf.mxu3 }
 0x349   :  { %622 = vmatmul.f32.gmra.mxu2 %v524_v2 }
 0x34c   :  { %v1586_v3 = vpop.f32.mrf.mxu2  ;;  %v1588_v4 = vpop.f32.mrf.mxu3 }
 0x354   :  { %v1590_v7 = vpop.f32.mrf.mxu2  ;;  %v1592_v8 = vpop.f32.mrf.mxu3 }
 0x35c   :  { %v1594_v9 = vpop.f32.mrf.mxu2  ;;  %v1596_v55 = vpop.f32.mrf.mxu3 }
 0x364   :  { %v1598_v56 = vpop.f32.mrf.mxu2  ;;  %v1600_v57 = vpop.f32.mrf.mxu3 }
 0x36c   :  { %v1602_v50 = vpop.f32.mrf.mxu2  ;;  %v1604_v60 = vpop.f32.mrf.mxu3 }
 0x374   :  { %v1606_v10 = vpop.f32.mrf.mxu2  ;;  %v1608_v11 = vpop.f32.mrf.mxu3 }
 0x37c   :  { %v1610_v12 = vpop.f32.mrf.mxu2  ;;  %v1612_v13 = vpop.f32.mrf.mxu3 }
 0x384   :  { %v1614_v14 = vpop.f32.mrf.mxu2  ;;  %v1616_v6 = vpop.f32.mrf.mxu3 }
 0x38c   :  { %v1618_v17 = vpop.f32.mrf.mxu2  ;;  %v1620_v18 = vpop.f32.mrf.mxu3 }
 0x394   :  { %v1622_v19 = vpop.f32.mrf.mxu2  ;;  %v1624_v20 = vpop.f32.mrf.mxu3 }
 0x39c   :  { %v1626_v21 = vpop.f32.mrf.mxu2  ;;  %v1628_v22 = vpop.f32.mrf.mxu3 }
 0x3a4   :  { %v1630_v5 = vpop.f32.mrf.mxu2  ;;  %v1632_v30 = vpop.f32.mrf.mxu3 }
 0x3ac   :  { %v1634_v61 = vpop.f32.mrf.mxu2  ;;  %v1636_v23 = vpop.f32.mrf.mxu3 }
 0x3ad   :  { %688 = vmatpush.msra.mxu1 %v1636_v23 }
 0x3af   :  { %689 = vmatpush.msra.mxu1 %v1632_v30 }
 0x3b1   :  { %690 = vmatpush.msra.mxu1 %v1628_v22 }
 0x3b3   :  { %691 = vmatpush.msra.mxu1 %v1624_v20 }
 0x3b4   :  { %v1642_v25 = vpop.f32.mrf.mxu2 }
 0x3b5   :  { %692 = vmatpush.msra.mxu1 %v1620_v18 }
 0x3b7   :  { %693 = vmatpush.msra.mxu1 %v1616_v6 }
 0x3b9   :  { %694 = vmatpush.msra.mxu1 %v1612_v13 }
 0x3bb   :  { %695 = vmatpush.msra.mxu1 %v1608_v11 }
 0x3bc   :  { %v1648_v24 = vpop.f32.mrf.mxu2 }
 0x3bd   :  { %668 = vmatpush.msrb.mxu3 %v1648_v24  ;;  %696 = vmatpush.msra.mxu1 %v1604_v60 }
 0x3bf   :  { %669 = vmatpush.msrb.mxu3 %v1642_v25  ;;  %697 = vmatpush.msra.mxu1 %v1600_v57 }
 0x3c1   :  { %670 = vmatpush.msrb.mxu3 %v1634_v61  ;;  %698 = vmatpush.msra.mxu1 %v1596_v55 }
 0x3c3   :  { %671 = vmatpush.msrb.mxu3 %v1630_v5  ;;  %699 = vmatpush.msra.mxu1 %v1592_v8 }
 0x3c4   :  { %v1658_v58 = vpop.f32.mrf.mxu2 }
 0x3c5   :  { %672 = vmatpush.msrb.mxu3 %v1626_v21  ;;  %700 = vmatpush.msra.mxu1 %v1588_v4 }
 0x3c7   :  { %673 = vmatpush.msrb.mxu3 %v1622_v19  ;;  %701 = vmatpush.msra.mxu1 %v1583_v45 }
 0x3c9   :  { %674 = vmatpush.msrb.mxu3 %v1618_v17 }
 0x3cb   :  { %675 = vmatpush.msrb.mxu3 %v1614_v14 }
 0x3cc   :  { %v1666_v32 = vpop.f32.mrf.mxu2 }
 0x3cd   :  { %676 = vmatpush.msrb.mxu3 %v1610_v12  ;;  %702 = vmatpush.msra.mxu1 %v1666_v32 }
 0x3cf   :  { %677 = vmatpush.msrb.mxu3 %v1606_v10  ;;  %703 = vmatpush.msra.mxu1 %v1658_v58 }
 0x3d0   :  { %704 = vmatmul.f32.vlgmr.msra.gmra.mxu1 %v1035_v63 }
 0x3d1   :  { %678 = vmatpush.msrb.mxu3 %v1602_v50 }
 0x3d3   :  { %679 = vmatpush.msrb.mxu3 %v1598_v56 }
 0x3d5   :  { %680 = vmatpush.msrb.mxu3 %v1594_v9 }
 0x3d7   :  { %681 = vmatpush.msrb.mxu3 %v1590_v7 }
 0x3d9   :  { %682 = vmatpush.msrb.mxu3 %v1586_v3 }
 0x3db   :  { %683 = vmatpush.msrb.mxu3 %v1581_v42 }
 0x3dc   :  { %684 = vmatmul.f32.vlgmr.msrb.gmra.mxu3 %v1035_v63 }
 0x44d   :  { %v705_v62 = vpop.f32.mrf.mxu1 }
 0x45f   :  { %v685_v27 = vpop.f32.mrf.mxu3 }
 0x460   :  { %v706_v26 = vadd.f32 %v705_v62, %v685_v27 }
 0x462   :  { %v1680_v28 = vmul.f32 0.00390625, %v706_v26 }
 0x464   :  { %v1683_v59 = vperm.slane %v1680_v28, 0 }
 0x466   :  { %v725_v35 = vsub.f32 %v1648_v24, %v1683_v59  ;;  %v724_v0 = vsub.f32 %v1642_v25, %v1683_v59  ;;  %v740_v29 = vsub.f32 %v1632_v30, %v1683_v59  ;;  %v741_v31 = vsub.f32 %v1636_v23, %v1683_v59 }
 0x467   :  { %v723_v44 = vsub.f32 %v1634_v61, %v1683_v59  ;;  %v739_v38 = vsub.f32 %v1628_v22, %v1683_v59  ;;  %v722_v49 = vsub.f32 %v1630_v5, %v1683_v59  ;;  %v738_v52 = vsub.f32 %v1624_v20, %v1683_v59 }
 0x468   :  { %v757_v47 = vmul.f32 %v725_v35, %v725_v35  ;;  %v773_v1 = vmul.f32 %v741_v31, %v741_v31  ;;  %v756_v51 = vmul.f32 %v724_v0, %v724_v0  ;;  %v772_v37 = vmul.f32 %v740_v29, %v740_v29 }
 0x469   :  { %v721_v41 = vsub.f32 %v1626_v21, %v1683_v59  ;;  %v755_v34 = vmul.f32 %v723_v44, %v723_v44  ;;  %v737_v15 = vsub.f32 %v1620_v18, %v1683_v59  ;;  %v771_v16 = vmul.f32 %v739_v38, %v739_v38 }
 0x46a   :  { %774 = vmatpush.msra.mxu3 %v757_v47  ;;  %794 = vmatpush.msrb.mxu1 %v773_v1  ;;  %v720_v36 = vsub.f32 %v1622_v19, %v1683_v59  ;;  %v754_v33 = vmul.f32 %v722_v49, %v722_v49  ;;  %v736_v53 = vsub.f32 %v1616_v6, %v1683_v59 }
 0x46b   :  { %v770_v54 = vmul.f32 %v738_v52, %v738_v52  ;;  %v719_v40 = vsub.f32 %v1618_v17, %v1683_v59  ;;  %v753_v43 = vmul.f32 %v721_v41, %v721_v41  ;;  %v735_v46 = vsub.f32 %v1612_v13, %v1683_v59 }
 0x46c   :  { %775 = vmatpush.msra.mxu3 %v756_v51  ;;  %795 = vmatpush.msrb.mxu1 %v772_v37  ;;  %v769_v48 = vmul.f32 %v737_v15, %v737_v15  ;;  %v718_v39 = vsub.f32 %v1614_v14, %v1683_v59  ;;  %v752_v2 = vmul.f32 %v720_v36, %v720_v36 }
 0x46d   :  { %v734_v62 = vsub.f32 %v1608_v11, %v1683_v59  ;;  %v768_v27 = vmul.f32 %v736_v53, %v736_v53  ;;  %v717_v26 = vsub.f32 %v1610_v12, %v1683_v59  ;;  %v751_v35 = vmul.f32 %v719_v40, %v719_v40 }
 0x46e   :  { %776 = vmatpush.msra.mxu3 %v755_v34  ;;  %796 = vmatpush.msrb.mxu1 %v771_v16  ;;  %v733_v0 = vsub.f32 %v1604_v60, %v1683_v59  ;;  %v767_v29 = vmul.f32 %v735_v46, %v735_v46  ;;  %v716_v31 = vsub.f32 %v1606_v10, %v1683_v59 }
 0x46f   :  { %v750_v44 = vmul.f32 %v718_v39, %v718_v39  ;;  %v732_v47 = vsub.f32 %v1600_v57, %v1683_v59  ;;  %v766_v38 = vmul.f32 %v734_v62, %v734_v62  ;;  %v715_v1 = vsub.f32 %v1602_v50, %v1683_v59 }
 0x470   :  { %777 = vmatpush.msra.mxu3 %v754_v33  ;;  %797 = vmatpush.msrb.mxu1 %v770_v54  ;;  %v749_v49 = vmul.f32 %v717_v26, %v717_v26  ;;  %v731_v51 = vsub.f32 %v1596_v55, %v1683_v59  ;;  %v765_v52 = vmul.f32 %v733_v0, %v733_v0 }
 0x471   :  { %v714_v37 = vsub.f32 %v1598_v56, %v1683_v59  ;;  %v748_v41 = vmul.f32 %v716_v31, %v716_v31  ;;  %v730_v34 = vsub.f32 %v1592_v8, %v1683_v59  ;;  %v764_v15 = vmul.f32 %v732_v47, %v732_v47 }
 0x472   :  { %778 = vmatpush.msra.mxu3 %v753_v43  ;;  %798 = vmatpush.msrb.mxu1 %v769_v48  ;;  %v713_v16 = vsub.f32 %v1594_v9, %v1683_v59  ;;  %v747_v36 = vmul.f32 %v715_v1, %v715_v1  ;;  %v729_v33 = vsub.f32 %v1588_v4, %v1683_v59 }
 0x473   :  { %v763_v53 = vmul.f32 %v731_v51, %v731_v51  ;;  %v712_v54 = vsub.f32 %v1590_v7, %v1683_v59  ;;  %v746_v40 = vmul.f32 %v714_v37, %v714_v37  ;;  %v728_v43 = vsub.f32 %v1583_v45, %v1683_v59 }
 0x474   :  { %779 = vmatpush.msra.mxu3 %v752_v2  ;;  %799 = vmatpush.msrb.mxu1 %v768_v27  ;;  %v762_v46 = vmul.f32 %v730_v34, %v730_v34  ;;  %v711_v48 = vsub.f32 %v1586_v3, %v1683_v59  ;;  %v745_v39 = vmul.f32 %v713_v16, %v713_v16  ;;  %v815_v16 = vld [vmem:[%s1865_s4] sm:$0x1]  ;;  %s1036_s4 = smov [#allocation2]  }
 0x475   :  { %v727_v2 = vsub.f32 %v1666_v32, %v1683_v59  ;;  %v761_v62 = vmul.f32 %v729_v33, %v729_v33  ;;  %v710_v27 = vsub.f32 %v1581_v42, %v1683_v59  ;;  %v744_v26 = vmul.f32 %v712_v54, %v712_v54 }
 0x476   :  { %780 = vmatpush.msra.mxu3 %v751_v35  ;;  %800 = vmatpush.msrb.mxu1 %v767_v29  ;;  %v726_v35 = vsub.f32 %v1658_v58, %v1683_v59  ;;  %v760_v0 = vmul.f32 %v728_v43, %v728_v43  ;;  %v743_v29 = vmul.f32 %v711_v48, %v711_v48 }
 0x477   :  { %v759_v31 = vmul.f32 %v727_v2, %v727_v2 }
 0x478   :  { %781 = vmatpush.msra.mxu3 %v750_v44  ;;  %801 = vmatpush.msrb.mxu1 %v766_v38  ;;  %v742_v44 = vmul.f32 %v710_v27, %v710_v27  ;;  %v758_v47 = vmul.f32 %v726_v35, %v726_v35 }
 0x47a   :  { %782 = vmatpush.msra.mxu3 %v749_v49  ;;  %802 = vmatpush.msrb.mxu1 %v765_v52 }
 0x47c   :  { %783 = vmatpush.msra.mxu3 %v748_v41  ;;  %803 = vmatpush.msrb.mxu1 %v764_v15 }
 0x47e   :  { %784 = vmatpush.msra.mxu3 %v747_v36  ;;  %804 = vmatpush.msrb.mxu1 %v763_v53  ;;  %v828_v53 = vld [vmem:[%s1867_s6] sm:$0x1]  ;;  %s937_s6 = sshll.u32 %s1036_s4, 4  ;;  %s938_s6 = int_to_ptr.vmem [resolvable:$true] %s937_s6 }
 0x480   :  { %785 = vmatpush.msra.mxu3 %v746_v40  ;;  %805 = vmatpush.msrb.mxu1 %v762_v46 }
 0x482   :  { %786 = vmatpush.msra.mxu3 %v745_v39  ;;  %806 = vmatpush.msrb.mxu1 %v761_v62 }
 0x484   :  { %787 = vmatpush.msra.mxu3 %v744_v26  ;;  %807 = vmatpush.msrb.mxu1 %v760_v0 }
 0x486   :  { %788 = vmatpush.msra.mxu3 %v743_v29  ;;  %808 = vmatpush.msrb.mxu1 %v759_v31 }
 0x488   :  { %789 = vmatpush.msra.mxu3 %v742_v44  ;;  %809 = vmatpush.msrb.mxu1 %v758_v47 }
 0x489   :  { %790 = vmatmul.f32.vlgmr.msra.gmra.mxu3 %v1035_v63  ;;  %810 = vmatmul.f32.vlgmr.msrb.gmra.mxu1 %v1035_v63 }
 0x506   :  { %v811_v38 = vpop.f32.mrf.mxu1 }
 0x50c   :  { %v791_v1 = vpop.f32.mrf.mxu3 }
 0x50d   :  { %v812_v49 = vadd.f32 %v811_v38, %v791_v1 }
 0x50f   :  { %v814_v59 = vmul.f32 0.00390625, %v812_v49 }
 0x511   :  { %v816_v51 = vadd.f32 1e-05, %v814_v59 }
 0x513   :  { %1007 = vrsqrt.f32 %v816_v51  ;;  %vm823_vm6 = vweird.f32 %v816_v51 }
 0x519   :  { %v1008_v52 = vpop.eup %1007 }
 0x51a   :  { %v818_v37 = vmul.f32 %v1008_v52, %v816_v51  ;;  %vm824_vm5 = vweird.f32 %v1008_v52 }
 0x51b   :  { %vm825_vm7 = vmor %vm823_vm6, %vm824_vm5 }
 0x51c   :  { %v819_v41 = vmul.f32 %v1008_v52, %v818_v37 }
 0x51e   :  { %v820_v34 = vmul.f32 0.5, %v819_v41 }
 0x520   :  { %v821_v15 = vsub.f32 1.5, %v820_v34 }
 0x522   :  { %v822_v36 = vmul.f32 %v1008_v52, %v821_v15 }
 0x524   :  { %v826_v63 = vsel %vm825_vm7, %v1008_v52, %v822_v36 }
 0x525   :  { %v827_v33 = vmul.f32 %v826_v63, %v815_v16 }
 0x527   :  { %v829_v54 = vmul.f32 %v827_v33, %v1680_v28  ;;  %v1758_v43 = vperm.slane %v827_v33, 0 }
 0x529   :  { %v830_v40 = vsub.f32 %v828_v53, %v829_v54  ;;  %v834_v48 = vmul.f32 %v1758_v43, %v1581_v42  ;;  %v835_v39 = vmul.f32 %v1758_v43, %v1586_v3  ;;  %v836_v2 = vmul.f32 %v1758_v43, %v1590_v7 }
 0x52a   :  { %v837_v62 = vmul.f32 %v1758_v43, %v1594_v9  ;;  %v838_v28 = vmul.f32 %v1758_v43, %v1598_v56  ;;  %v839_v35 = vmul.f32 %v1758_v43, %v1602_v50  ;;  %v840_v7 = vmul.f32 %v1758_v43, %v1606_v10 }
 0x52b   :  { %v1760_v46 = vperm.slane %v830_v40, 0  ;;  %v841_v9 = vmul.f32 %v1758_v43, %v1610_v12  ;;  %v842_v29 = vmul.f32 %v1758_v43, %v1614_v14  ;;  %v843_v31 = vmul.f32 %v1758_v43, %v1618_v17 }
 0x52c   :  { %v844_v44 = vmul.f32 %v1758_v43, %v1622_v19  ;;  %v845_v47 = vmul.f32 %v1758_v43, %v1626_v21  ;;  %v846_v38 = vmul.f32 %v1758_v43, %v1630_v5  ;;  %v847_v1 = vmul.f32 %v1758_v43, %v1634_v61 }
 0x52d   :  { %v869_v27 = vadd.f32 %v1760_v46, %v834_v48  ;;  %v870_v26 = vadd.f32 %v1760_v46, %v835_v39  ;;  %v871_v42 = vadd.f32 %v1760_v46, %v836_v2  ;;  %v872_v3 = vadd.f32 %v1760_v46, %v837_v62 }
 0x52e   :  { %v873_v0 = vadd.f32 %v1760_v46, %v838_v28  ;;  %v874_v56 = vadd.f32 %v1760_v46, %v839_v35  ;;  %v875_v50 = vadd.f32 %v1760_v46, %v840_v7  ;;  %v876_v10 = vadd.f32 %v1760_v46, %v841_v9 }
 0x52f   :  { %901 = vst [vmem:[#allocation2] sm:$0xff] %v869_v27  ;;  %v877_v12 = vadd.f32 %v1760_v46, %v842_v29  ;;  %v878_v14 = vadd.f32 %v1760_v46, %v843_v31  ;;  %v879_v17 = vadd.f32 %v1760_v46, %v844_v44  ;;  %v880_v19 = vadd.f32 %v1760_v46, %v845_v47 }
 0x530   :  { %902 = vst [vmem:[#allocation2 + $0x8] sm:$0xff] %v870_v26  ;;  %v848_v49 = vmul.f32 %v1758_v43, %v1642_v25  ;;  %v881_v21 = vadd.f32 %v1760_v46, %v846_v38  ;;  %v849_v59 = vmul.f32 %v1758_v43, %v1648_v24  ;;  %v882_v5 = vadd.f32 %v1760_v46, %v847_v1 }
 0x531   :  { %903 = vst [vmem:[#allocation2 + $0x10] sm:$0xff] %v871_v42  ;;  %v850_v51 = vmul.f32 %v1758_v43, %v1658_v58  ;;  %v851_v52 = vmul.f32 %v1758_v43, %v1666_v32  ;;  %v852_v37 = vmul.f32 %v1758_v43, %v1583_v45  ;;  %v853_v41 = vmul.f32 %v1758_v43, %v1588_v4 }
 0x532   :  { %904 = vst [vmem:[#allocation2 + $0x18] sm:$0xff] %v872_v3  ;;  %v883_v61 = vadd.f32 %v1760_v46, %v848_v49  ;;  %v884_v25 = vadd.f32 %v1760_v46, %v849_v59  ;;  %v854_v34 = vmul.f32 %v1758_v43, %v1592_v8  ;;  %v855_v15 = vmul.f32 %v1758_v43, %v1596_v55 }
 0x533   :  { %905 = vst [vmem:[#allocation2 + $0x20] sm:$0xff] %v873_v0  ;;  %v885_v24 = vadd.f32 %v1760_v46, %v850_v51  ;;  %v886_v58 = vadd.f32 %v1760_v46, %v851_v52  ;;  %v887_v32 = vadd.f32 %v1760_v46, %v852_v37  ;;  %v888_v45 = vadd.f32 %v1760_v46, %v853_v41 }
 0x534   :  { %906 = vst [vmem:[#allocation2 + $0x28] sm:$0xff] %v874_v56  ;;  %v856_v16 = vmul.f32 %v1758_v43, %v1600_v57  ;;  %v889_v4 = vadd.f32 %v1760_v46, %v854_v34  ;;  %v857_v36 = vmul.f32 %v1758_v43, %v1604_v60  ;;  %v890_v8 = vadd.f32 %v1760_v46, %v855_v15 }
 0x535   :  { %907 = vst [vmem:[#allocation2 + $0x30] sm:$0xff] %v875_v50  ;;  %v858_v63 = vmul.f32 %v1758_v43, %v1608_v11  ;;  %v859_v33 = vmul.f32 %v1758_v43, %v1612_v13  ;;  %v860_v53 = vmul.f32 %v1758_v43, %v1616_v6  ;;  %v861_v54 = vmul.f32 %v1758_v43, %v1620_v18 }
 0x536   :  { %908 = vst [vmem:[#allocation2 + $0x38] sm:$0xff] %v876_v10  ;;  %v891_v55 = vadd.f32 %v1760_v46, %v856_v16  ;;  %v892_v57 = vadd.f32 %v1760_v46, %v857_v36  ;;  %v862_v40 = vmul.f32 %v1758_v43, %v1624_v20  ;;  %v863_v48 = vmul.f32 %v1758_v43, %v1628_v22 }
 0x537   :  { %909 = vst [vmem:[#allocation2 + $0x40] sm:$0xff] %v877_v12  ;;  %v893_v60 = vadd.f32 %v1760_v46, %v858_v63  ;;  %v894_v11 = vadd.f32 %v1760_v46, %v859_v33  ;;  %v895_v13 = vadd.f32 %v1760_v46, %v860_v53  ;;  %v896_v6 = vadd.f32 %v1760_v46, %v861_v54 }
 0x538   :  { %910 = vst [vmem:[#allocation2 + $0x48] sm:$0xff] %v878_v14  ;;  %v864_v39 = vmul.f32 %v1758_v43, %v1632_v30  ;;  %v897_v18 = vadd.f32 %v1760_v46, %v862_v40  ;;  %v865_v2 = vmul.f32 %v1758_v43, %v1636_v23  ;;  %v898_v20 = vadd.f32 %v1760_v46, %v863_v48 }
 0x539   :  { %911 = vst [vmem:[#allocation2 + $0x50] sm:$0xff] %v879_v17 }
 0x53a   :  { %912 = vst [vmem:[#allocation2 + $0x58] sm:$0xff] %v880_v19  ;;  %v899_v22 = vadd.f32 %v1760_v46, %v864_v39  ;;  %v900_v30 = vadd.f32 %v1760_v46, %v865_v2 }
 0x53b   :  { %913 = vst [vmem:[#allocation2 + $0x60] sm:$0xff] %v881_v21 }
 0x53c   :  { %914 = vst [vmem:[#allocation2 + $0x68] sm:$0xff] %v882_v5 }
 0x53d   :  { %915 = vst [vmem:[#allocation2 + $0x70] sm:$0xff] %v883_v61 }
 0x53e   :  { %916 = vst [vmem:[#allocation2 + $0x78] sm:$0xff] %v884_v25 }
 0x53f   :  { %917 = vst [vmem:[#allocation2 + $0x80] sm:$0xff] %v885_v24 }
 0x540   :  { %918 = vst [vmem:[#allocation2 + $0x88] sm:$0xff] %v886_v58 }
 0x541   :  { %919 = vst [vmem:[#allocation2 + $0x90] sm:$0xff] %v887_v32 }
 0x542   :  { %920 = vst [vmem:[#allocation2 + $0x98] sm:$0xff] %v888_v45 }
 0x543   :  { %921 = vst [vmem:[#allocation2 + $0xa0] sm:$0xff] %v889_v4 }
 0x544   :  { %922 = vst [vmem:[#allocation2 + $0xa8] sm:$0xff] %v890_v8 }
 0x545   :  { %923 = vst [vmem:[#allocation2 + $0xb0] sm:$0xff] %v891_v55 }
 0x546   :  { %924 = vst [vmem:[#allocation2 + $0xb8] sm:$0xff] %v892_v57 }
 0x547   :  { %925 = vst [vmem:[#allocation2 + $0xc0] sm:$0xff] %v893_v60 }
 0x548   :  { %926 = vst [vmem:[#allocation2 + $0xc8] sm:$0xff] %v894_v11 }
 0x549   :  { %927 = vst [vmem:[#allocation2 + $0xd0] sm:$0xff] %v895_v13 }
 0x54a   :  { %928 = vst [vmem:[#allocation2 + $0xd8] sm:$0xff] %v896_v6 }
 0x54b   :  { %929 = vst [vmem:[#allocation2 + $0xe0] sm:$0xff] %v897_v18 }
 0x54c   :  { %930 = vst [vmem:[#allocation2 + $0xe8] sm:$0xff] %v898_v20 }
 0x54d   :  { %931 = vst [vmem:[#allocation2 + $0xf0] sm:$0xff] %v899_v22 }
 0x54e   :  { %932 = vst [vmem:[#allocation2 + $0xf8] sm:$0xff] %v900_v30 }
 0x54f   :  { %945 = dma.vmem_to_hbm [thread:$0]  %s938_s6, 4096, %s940_s8, [#allocation3], %s1037_s1, %s1037_s1, %s1038_s9  }
 0x550   :  { %1033 = dma.done.wait [#allocation3], 4096  }
 0x551   :  { %1034 = vsyncadd [#allocation3], 4294963200 }
 0x552   :  { %950 = vsyncpa [#allocation3], 1 }

</bundles_post_ra>
